<compile_context>
chip_gen: v7x
topology: tpu7x:2x2x1
jax: 0.10.0
libtpu: 0.0.40
codegen_flags: <defaults>
</compile_context>

<pallas_src>
import functools

import jax
import jax.numpy as jnp
from jax.experimental import pallas as pl
from jax.experimental.pallas import tpu as pltpu


# ------------------------------ Pallas kernel ------------------------------ #

def _ckm_fused_kernel(x_ref, w1_ref, beta_ref, ssel_ref, sselt_ref,
                      gsel_ref, gseltg_ref, w2_ref, b2_ref, o_ref, *,
                      inv_count, eps, cols1_p):
    """Fused conv_transpose1 + GroupNorm + GELU + conv_transpose2 (+ bias).

    Block = S whole samples x hw input pixels = TM token rows.
      x_ref      : (TM, Cin)                 matmul dtype (bf16 / f32)
      w1_ref     : (Cin, cols1_p)            matmul dtype
      beta_ref   : (1, cols1_p)     f32      GN beta (repeated over kk1)
      ssel_ref   : (S_pad, TM)      f32      row    -> sample one-hot
      sselt_ref  : (TM, S_pad)      f32
      gsel_ref   : (cols1_p, G_pad) f32      column -> group one-hot (stats)
      gseltg_ref : (G_pad, cols1_p) f32      group  -> column, gamma folded in
      w2_ref     : (cols1_p, OUTP)           matmul dtype (block-diagonal w2)
      b2_ref     : (1, OUTP)        f32
      o_ref      : (TM, OUTP)       f32
    """
    # conv_transpose1 (kernel == stride) as one big matmul, f32 accumulation.
    y = jnp.dot(x_ref[...], w1_ref[...], preferred_element_type=jnp.float32)

    # GroupNorm statistics via one-hot indicator matmuls (rides the MXU; no
    # narrow lane slices / concatenates).  Single pass: var = E[y^2] - E[y]^2.
    ssel = ssel_ref[...]
    gsel = gsel_ref[...]
    s1 = jnp.dot(ssel, y, preferred_element_type=jnp.float32)        # (S, cols1)
    s2 = jnp.dot(ssel, y * y, preferred_element_type=jnp.float32)    # (S, cols1)
    mean = jnp.dot(s1, gsel, preferred_element_type=jnp.float32) * inv_count
    ex2 = jnp.dot(s2, gsel, preferred_element_type=jnp.float32) * inv_count
    rstd = jax.lax.rsqrt(ex2 - mean * mean + eps)                     # (S, G)

    # Broadcast per-(sample, group) affine back to (TM, cols1_p) with gamma
    # already folded into gseltg.  scale = rstd*gamma ; shift = mean*rstd*gamma.
    gg = gseltg_ref[...]
    sc_cols = jnp.dot(rstd, gg, preferred_element_type=jnp.float32)          # (S, cols1_p)
    sh_cols = jnp.dot(mean * rstd, gg, preferred_element_type=jnp.float32)   # (S, cols1_p)
    both = jnp.concatenate([sc_cols, sh_cols], axis=1)               # (S, 2*cols1_p)
    both_full = jnp.dot(sselt_ref[...], both,
                        preferred_element_type=jnp.float32)          # (TM, 2*cols1_p)
    scale_full = both_full[:, :cols1_p]
    shift_full = both_full[:, cols1_p:]

    yn = y * scale_full - shift_full + beta_ref[...]
    # exact (erf-based) GELU, matching nn.GELU()
    ya = 0.5 * yn * (1.0 + jax.lax.erf(yn * 0.7071067811865476))

    # conv_transpose2 fused in via the block-diagonal (over kk1 intermediate
    # pixel positions) weight -> no HBM round-trip / 6-D transpose in between.
    y2 = jnp.dot(ya.astype(w2_ref.dtype), w2_ref[...],
                 preferred_element_type=jnp.float32)
    o_ref[...] = y2 + b2_ref[...]


# ------------------------------- Wrapper ----------------------------------- #

def _round_up(x, m):
    return ((x + m - 1) // m) * m


def _samples_per_block(n_samples, rows_per_sample, max_rows):
    """Largest divisor d of n_samples with d*rows <= max_rows and rows % 8 == 0."""
    best = None
    for d in range(1, n_samples + 1):
        if n_samples % d:
            continue
        rows = d * rows_per_sample
        if rows > max_rows:
            continue
        if rows % 8 == 0 or d == n_samples:
            best = d
    if best is None:           # fall back to a single full block (block == array)
        best = n_samples
    return best


def ckm_decoder_forward(x, params, state_labels, *, groups, eps=1e-5,
                        use_bf16=True, max_block_rows=512):
    """x: (T, B, hidden_dim, h, w) f32 -> (T, B, n_sel, h*k1*k2, w*k1*k2) f32."""
    # TODO(synk): the resize_patch_embed / pinvs (stage_info) path is not
    # implemented; the base proj weights are used unchanged (the `else` branches).
    w1, gamma, beta, w2, b2 = (params[k] for k in ("w1", "gamma", "beta",
                                                   "w2", "b2"))
    T, B, c_in, h, w = x.shape
    n = T * B
    hw = h * w
    c_mid, k1h, k1w = w1.shape[1], w1.shape[2], w1.shape[3]
    kk1 = k1h * k1w
    cols1 = c_mid * kk1
    cols1_p = _round_up(max(cols1, 128), 128)          # lane-dense intermediate

    mm_dtype = jnp.bfloat16 if use_bf16 else jnp.float32

    # ---- tokens: (N*hw, Cin); rows of a sample stay contiguous ----
    # TODO(synk): x could be read in its native (Cin, hw) layout inside the
    # kernel to avoid this small XLA transpose pass over the input.
    x_tok = x.reshape(n, c_in, hw).transpose(0, 2, 1).reshape(n * hw, c_in)
    x_tok = x_tok.astype(mm_dtype)

    # ---- conv_transpose1 weight + GroupNorm beta, as columns (c, p, q) ----
    w1_mat = w1.reshape(c_in, cols1)
    gamma_cols = jnp.repeat(gamma.astype(jnp.float32), kk1)
    beta_cols = jnp.repeat(beta.astype(jnp.float32), kk1)
    if cols1_p != cols1:
        w1_mat = jnp.pad(w1_mat, ((0, 0), (0, cols1_p - cols1)))
        gamma_cols = jnp.pad(gamma_cols, (0, cols1_p - cols1))
        beta_cols = jnp.pad(beta_cols, (0, cols1_p - cols1))
    w1_mat = w1_mat.astype(mm_dtype)
    beta_row = beta_cols[None, :]

    # ---- conv_transpose2: selected channels, block-diagonal over positions --
    # Output columns ordered (d, p, r, q, s) so the post-kernel pixel shuffle
    # moves contiguous k1w*k2w runs (better-coalesced XLA transpose).
    w2_sel = w2[:, state_labels]                      # (Cmid, n_sel, k2h, k2w)
    b2_sel = b2[state_labels]
    n_sel, k2h, k2w = w2_sel.shape[1], w2_sel.shape[2], w2_sel.shape[3]
    kk2 = k2h * k2w
    out_cols = n_sel * kk1 * kk2
    out_cols_p = _round_up(max(out_cols, 128), 128)    # lane-dense stores

    w2_big = jnp.einsum(
        "pP,qQ,cdrs->cpqdPrQs",
        jnp.eye(k1h, dtype=jnp.float32), jnp.eye(k1w, dtype=jnp.float32),
        w2_sel.astype(jnp.float32)).reshape(cols1, out_cols)
    b_big = jnp.repeat(b2_sel.astype(jnp.float32), k1h * k2h * k1w * k2w)[None, :]
    if cols1_p != cols1:
        w2_big = jnp.pad(w2_big, ((0, cols1_p - cols1), (0, 0)))
    if out_cols_p != out_cols:
        w2_big = jnp.pad(w2_big, ((0, 0), (0, out_cols_p - out_cols)))
        b_big = jnp.pad(b_big, ((0, 0), (0, out_cols_p - out_cols)))
    w2_big = w2_big.astype(mm_dtype)

    # ---- M tiling: several whole samples per block, rows multiple of 8 ----
    s_blk = _samples_per_block(n, hw, max_block_rows)
    tm = s_blk * hw
    grid = ((n * hw) // tm,)

    # ---- one-hot indicator matrices for GN stats (padded up to >= 8) ----
    s_pad = max(8, _round_up(s_blk, 8))
    g_pad = max(8, _round_up(groups, 8))
    row_sample = jnp.arange(tm) // hw
    ssel = (jnp.arange(s_pad)[:, None] == row_sample[None, :]).astype(jnp.float32)
    sselt = ssel.T
    cpg = c_mid // groups
    col_group = (jnp.arange(cols1_p) // kk1) // cpg
    valid_col = jnp.arange(cols1_p) < cols1
    gsel = ((col_group[:, None] == jnp.arange(g_pad)[None, :])
            & valid_col[:, None]).astype(jnp.float32)        # (cols1_p, G_pad)
    gselt_g = gsel.T * gamma_cols[None, :]                    # gamma folded in
    inv_count = 1.0 / float(hw * kk1 * cpg)   # elements per (sample, group)

    # TODO(synk): for very large hidden_dim, add a grid axis tiling cols1_p /
    # w2_big columns so the resident weights also fit v7x's 64 MiB VMEM.
    out_flat = pl.pallas_call(
        functools.partial(_ckm_fused_kernel, inv_count=inv_count, eps=eps,
                          cols1_p=cols1_p),
        out_shape=jax.ShapeDtypeStruct((n * hw, out_cols_p), jnp.float32),
        grid=grid,
        in_specs=[
            pl.BlockSpec((tm, c_in), lambda i: (i, 0)),
            pl.BlockSpec((c_in, cols1_p), lambda i: (0, 0)),
            pl.BlockSpec((1, cols1_p), lambda i: (0, 0)),
            pl.BlockSpec((s_pad, tm), lambda i: (0, 0)),
            pl.BlockSpec((tm, s_pad), lambda i: (0, 0)),
            pl.BlockSpec((cols1_p, g_pad), lambda i: (0, 0)),
            pl.BlockSpec((g_pad, cols1_p), lambda i: (0, 0)),
            pl.BlockSpec((cols1_p, out_cols_p), lambda i: (0, 0)),
            pl.BlockSpec((1, out_cols_p), lambda i: (0, 0)),
        ],
        out_specs=pl.BlockSpec((tm, out_cols_p), lambda i: (i, 0)),
        compiler_params=pltpu.CompilerParams(
            dimension_semantics=("parallel",),
            vmem_limit_bytes=48 * 1024 * 1024),
    )(x_tok, w1_mat, beta_row, ssel, sselt, gsel, gselt_g, w2_big, b_big)

    # ---- final pixel shuffle to NCHW (single XLA pass over the output) ----
    y2 = out_flat[:, :out_cols] if out_cols_p != out_cols else out_flat
    hh2, ww2 = h * k1h * k2h, w * k1w * k2w
    out = (y2.reshape(n, h, w, n_sel, k1h, k2h, k1w, k2w)
           .transpose(0, 3, 1, 4, 5, 2, 6, 7)
           .reshape(n, n_sel, hh2, ww2))
    return out.reshape(T, B, n_sel, hh2, ww2)


# --------------------------- Pure-JAX reference ----------------------------- #

def ckm_decoder_reference(x, params, state_labels, *, groups, eps=1e-5):
    w1, gamma, beta, w2, b2 = (params[k] for k in ("w1", "gamma", "beta",
                                                   "w2", "b2"))
    T, B, c_in, h, w = x.shape
    n = T * B
    xf = x.reshape(n, c_in, h, w)
    c_mid, k1h, k1w = w1.shape[1], w1.shape[2], w1.shape[3]
    hp = jax.lax.Precision.HIGHEST
    # conv_transpose2d with kernel == stride, no padding
    y1 = jnp.einsum("ncij,cdpq->ndipjq", xf, w1, precision=hp).reshape(
        n, c_mid, h * k1h, w * k1w)
    hh1, ww1 = h * k1h, w * k1w
    # GroupNorm (biased variance) + affine
    yg = y1.reshape(n, groups, c_mid // groups, hh1, ww1)
    mean = yg.mean(axis=(2, 3, 4), keepdims=True)
    var = ((yg - mean) ** 2).mean(axis=(2, 3, 4), keepdims=True)
    yn = ((yg - mean) / jnp.sqrt(var + eps)).reshape(n, c_mid, hh1, ww1)
    yn = yn * gamma[None, :, None, None] + beta[None, :, None, None]
    # exact GELU
    ya = 0.5 * yn * (1.0 + jax.lax.erf(yn / jnp.sqrt(2.0)))
    # conv_transpose2d #2 with selected output channels + bias
    w2_sel = w2[:, state_labels]
    b2_sel = b2[state_labels]
    n_sel, k2h, k2w = w2_sel.shape[1], w2_sel.shape[2], w2_sel.shape[3]
    y2 = jnp.einsum("ncij,cdpq->ndipjq", ya, w2_sel, precision=hp).reshape(
        n, n_sel, hh1 * k2h, ww1 * k2w)
    y2 = y2 + b2_sel[None, :, None, None]
    return y2.reshape(T, B, n_sel, hh1 * k2h, ww1 * k2w)


# ---------------------------------- Main ------------------------------------ #

if __name__ == "__main__":
    # Small configuration consistent with the module: hidden_dim=32,
    # out_chans=3, groups=4 (hidden_dim//4 = 8 mid channels), base kernels
    # (4,4)/(4,4), spatial_dims=2.
    T, B = 2, 2
    hidden_dim = 32
    out_chans = 3
    groups = 4
    k1 = k2 = 4
    h = w = 4
    c_mid = hidden_dim // 4

    key = jax.random.PRNGKey(0)
    kx, kw1, kw2, kb2, kbeta = jax.random.split(key, 5)

    x = jax.random.normal(kx, (T, B, hidden_dim, h, w), dtype=jnp.float32)

    params = {
        # ConvTranspose2d weight layout: (in_channels, out_channels, kH, kW)
        "w1": 0.1 * jax.random.normal(kw1, (hidden_dim, c_mid, k1, k1),
                                      dtype=jnp.float32),
        "gamma": jnp.ones((c_mid,), dtype=jnp.float32),          # GN affine
        "beta": 0.05 * jax.random.normal(kbeta, (c_mid,), dtype=jnp.float32),
        "w2": 0.1 * jax.random.normal(kw2, (c_mid, out_chans, k2, k2),
                                      dtype=jnp.float32),
        "b2": 0.1 * jax.random.normal(kb2, (out_chans,), dtype=jnp.float32),
    }

    # state_labels selects (and permutes) the second conv's output channels.
    state_labels = jnp.array([2, 0, 1], dtype=jnp.int32)

    ref = ckm_decoder_reference(x, params, state_labels, groups=groups)
    expected_shape = (T, B, int(state_labels.shape[0]), h * k1 * k2, w * k1 * k2)

    # f32 matmul path: tighter tolerance.
    out_f32 = jax.block_until_ready(
        ckm_decoder_forward(x, params, state_labels, groups=groups,
                            use_bf16=False))
    assert out_f32.shape == expected_shape, out_f32.shape
    err_f32 = float(jnp.max(jnp.abs(out_f32 - ref)))
    assert jnp.allclose(out_f32, ref, rtol=5e-3, atol=5e-3), (
        f"f32 path max abs err = {err_f32}")

    # bf16 matmul path (default, fast on v6e/v7x): looser tolerance.
    out_bf16 = jax.block_until_ready(
        ckm_decoder_forward(x, params, state_labels, groups=groups,
                            use_bf16=True))
    assert out_bf16.shape == expected_shape, out_bf16.shape
    err_bf16 = float(jnp.max(jnp.abs(out_bf16 - ref)))
    assert jnp.allclose(out_bf16, ref, rtol=2e-2, atol=2e-2), (
        f"bf16 path max abs err = {err_bf16}")

    print("KERNEL_OK")
</pallas_src>

<mosaic_0001>
module attributes {stable_mosaic.version = 11 : i64} {
  func.func @_ckm_fused_kernel(%arg0: i32, %arg1: memref<64x32xf32, #tpu.memory_space<vmem>>, %arg2: memref<32x128xf32, #tpu.memory_space<vmem>>, %arg3: memref<1x128xf32, #tpu.memory_space<vmem>>, %arg4: memref<8x64xf32, #tpu.memory_space<vmem>>, %arg5: memref<64x8xf32, #tpu.memory_space<vmem>>, %arg6: memref<128x8xf32, #tpu.memory_space<vmem>>, %arg7: memref<8x128xf32, #tpu.memory_space<vmem>>, %arg8: memref<128x768xf32, #tpu.memory_space<vmem>>, %arg9: memref<1x768xf32, #tpu.memory_space<vmem>>, %arg10: memref<64x768xf32, #tpu.memory_space<vmem>>) attributes {dimension_semantics = [#tpu.dimension_semantics<parallel>], iteration_bounds = array<i64: 1>, scalar_prefetch = 0 : i64, scratch_operands = 0 : i64, tpu.core_type = #tpu.core_type<tc>, window_params = [{transform_indices = @transform_0, window_bounds = array<i64: 64, 32>}, {pipeline_mode = #tpu.pipeline_mode<synchronous>, transform_indices = @transform_1, window_bounds = array<i64: 32, 128>}, {pipeline_mode = #tpu.pipeline_mode<synchronous>, transform_indices = @transform_2, window_bounds = array<i64: 1, 128>}, {pipeline_mode = #tpu.pipeline_mode<synchronous>, transform_indices = @transform_3, window_bounds = array<i64: 8, 64>}, {pipeline_mode = #tpu.pipeline_mode<synchronous>, transform_indices = @transform_4, window_bounds = array<i64: 64, 8>}, {pipeline_mode = #tpu.pipeline_mode<synchronous>, transform_indices = @transform_5, window_bounds = array<i64: 128, 8>}, {pipeline_mode = #tpu.pipeline_mode<synchronous>, transform_indices = @transform_6, window_bounds = array<i64: 8, 128>}, {pipeline_mode = #tpu.pipeline_mode<synchronous>, transform_indices = @transform_7, window_bounds = array<i64: 128, 768>}, {pipeline_mode = #tpu.pipeline_mode<synchronous>, transform_indices = @transform_8, window_bounds = array<i64: 1, 768>}, {transform_indices = @transform_9, window_bounds = array<i64: 64, 768>}]} {
    %c0 = arith.constant 0 : index
    %c0_0 = arith.constant 0 : index
    %0 = vector.load %arg1[%c0, %c0_0] : memref<64x32xf32, #tpu.memory_space<vmem>>, vector<64x32xf32>
    %c0_1 = arith.constant 0 : index
    %c0_2 = arith.constant 0 : index
    %1 = vector.load %arg2[%c0_1, %c0_2] : memref<32x128xf32, #tpu.memory_space<vmem>>, vector<32x128xf32>
    %cst = arith.constant dense<0.000000e+00> : vector<64x128xf32>
    %2 = tpu.matmul %0, %1, %cst {dimension_numbers = #tpu.dot_dimension_numbers<[1], [0], [0], [1], [0, 0, 1, 1], [], []>} : vector<64x32xf32>, vector<32x128xf32>, vector<64x128xf32> -> vector<64x128xf32>
    %c0_3 = arith.constant 0 : index
    %c0_4 = arith.constant 0 : index
    %3 = vector.load %arg4[%c0_3, %c0_4] : memref<8x64xf32, #tpu.memory_space<vmem>>, vector<8x64xf32>
    %c0_5 = arith.constant 0 : index
    %c0_6 = arith.constant 0 : index
    %4 = vector.load %arg6[%c0_5, %c0_6] : memref<128x8xf32, #tpu.memory_space<vmem>>, vector<128x8xf32>
    %cst_7 = arith.constant dense<0.000000e+00> : vector<8x128xf32>
    %5 = tpu.matmul %3, %2, %cst_7 {dimension_numbers = #tpu.dot_dimension_numbers<[1], [0], [0], [1], [0, 0, 1, 1], [], []>} : vector<8x64xf32>, vector<64x128xf32>, vector<8x128xf32> -> vector<8x128xf32>
    %6 = arith.mulf %2, %2 : vector<64x128xf32>
    %cst_8 = arith.constant dense<0.000000e+00> : vector<8x128xf32>
    %7 = tpu.matmul %3, %6, %cst_8 {dimension_numbers = #tpu.dot_dimension_numbers<[1], [0], [0], [1], [0, 0, 1, 1], [], []>} : vector<8x64xf32>, vector<64x128xf32>, vector<8x128xf32> -> vector<8x128xf32>
    %cst_9 = arith.constant dense<0.000000e+00> : vector<8x8xf32>
    %8 = tpu.matmul %5, %4, %cst_9 {dimension_numbers = #tpu.dot_dimension_numbers<[1], [0], [0], [1], [0, 0, 1, 1], [], []>} : vector<8x128xf32>, vector<128x8xf32>, vector<8x8xf32> -> vector<8x8xf32>
    %cst_10 = arith.constant 0.001953125 : f32
    %9 = vector.broadcast %cst_10 : f32 to vector<8x8xf32>
    %10 = arith.mulf %8, %9 : vector<8x8xf32>
    %cst_11 = arith.constant dense<0.000000e+00> : vector<8x8xf32>
    %11 = tpu.matmul %7, %4, %cst_11 {dimension_numbers = #tpu.dot_dimension_numbers<[1], [0], [0], [1], [0, 0, 1, 1], [], []>} : vector<8x128xf32>, vector<128x8xf32>, vector<8x8xf32> -> vector<8x8xf32>
    %cst_12 = arith.constant 0.001953125 : f32
    %12 = vector.broadcast %cst_12 : f32 to vector<8x8xf32>
    %13 = arith.mulf %11, %12 : vector<8x8xf32>
    %14 = arith.mulf %10, %10 : vector<8x8xf32>
    %15 = arith.subf %13, %14 : vector<8x8xf32>
    %cst_13 = arith.constant 9.99999974E-6 : f32
    %16 = vector.broadcast %cst_13 : f32 to vector<8x8xf32>
    %17 = arith.addf %15, %16 : vector<8x8xf32>
    %18 = math.rsqrt %17 : vector<8x8xf32>
    %c0_14 = arith.constant 0 : index
    %c0_15 = arith.constant 0 : index
    %19 = vector.load %arg7[%c0_14, %c0_15] : memref<8x128xf32, #tpu.memory_space<vmem>>, vector<8x128xf32>
    %cst_16 = arith.constant dense<0.000000e+00> : vector<8x128xf32>
    %20 = tpu.matmul %18, %19, %cst_16 {dimension_numbers = #tpu.dot_dimension_numbers<[1], [0], [0], [1], [0, 0, 1, 1], [], []>} : vector<8x8xf32>, vector<8x128xf32>, vector<8x128xf32> -> vector<8x128xf32>
    %21 = arith.mulf %10, %18 : vector<8x8xf32>
    %cst_17 = arith.constant dense<0.000000e+00> : vector<8x128xf32>
    %22 = tpu.matmul %21, %19, %cst_17 {dimension_numbers = #tpu.dot_dimension_numbers<[1], [0], [0], [1], [0, 0, 1, 1], [], []>} : vector<8x8xf32>, vector<8x128xf32>, vector<8x128xf32> -> vector<8x128xf32>
    %23 = tpu.concatenate %20, %22 in 1 : vector<8x128xf32>, vector<8x128xf32> -> vector<8x256xf32>
    %c0_18 = arith.constant 0 : index
    %c0_19 = arith.constant 0 : index
    %24 = vector.load %arg5[%c0_18, %c0_19] : memref<64x8xf32, #tpu.memory_space<vmem>>, vector<64x8xf32>
    %cst_20 = arith.constant dense<0.000000e+00> : vector<64x256xf32>
    %25 = tpu.matmul %24, %23, %cst_20 {dimension_numbers = #tpu.dot_dimension_numbers<[1], [0], [0], [1], [0, 0, 1, 1], [], []>} : vector<64x8xf32>, vector<8x256xf32>, vector<64x256xf32> -> vector<64x256xf32>
    %26 = vector.extract_strided_slice %25 {offsets = [0, 0], sizes = [64, 128], strides = [1, 1]} : vector<64x256xf32> to vector<64x128xf32>
    %27 = vector.extract_strided_slice %25 {offsets = [0, 128], sizes = [64, 128], strides = [1, 1]} : vector<64x256xf32> to vector<64x128xf32>
    %28 = arith.mulf %2, %26 : vector<64x128xf32>
    %29 = arith.subf %28, %27 : vector<64x128xf32>
    %c0_21 = arith.constant 0 : index
    %c0_22 = arith.constant 0 : index
    %30 = vector.load %arg3[%c0_21, %c0_22] : memref<1x128xf32, #tpu.memory_space<vmem>>, vector<1x128xf32>
    %31 = vector.broadcast %30 : vector<1x128xf32> to vector<64x128xf32>
    %32 = arith.addf %29, %31 : vector<64x128xf32>
    %cst_23 = arith.constant 5.000000e-01 : f32
    %33 = vector.broadcast %cst_23 : f32 to vector<64x128xf32>
    %34 = arith.mulf %33, %32 : vector<64x128xf32>
    %cst_24 = arith.constant 0.707106769 : f32
    %35 = vector.broadcast %cst_24 : f32 to vector<64x128xf32>
    %36 = arith.mulf %32, %35 : vector<64x128xf32>
    %37 = math.erf %36 : vector<64x128xf32>
    %cst_25 = arith.constant 1.000000e+00 : f32
    %38 = vector.broadcast %cst_25 : f32 to vector<64x128xf32>
    %39 = arith.addf %38, %37 : vector<64x128xf32>
    %40 = arith.mulf %34, %39 : vector<64x128xf32>
    %c0_26 = arith.constant 0 : index
    %c0_27 = arith.constant 0 : index
    %41 = vector.load %arg8[%c0_26, %c0_27] : memref<128x768xf32, #tpu.memory_space<vmem>>, vector<128x768xf32>
    %cst_28 = arith.constant dense<0.000000e+00> : vector<64x768xf32>
    %42 = tpu.matmul %40, %41, %cst_28 {dimension_numbers = #tpu.dot_dimension_numbers<[1], [0], [0], [1], [0, 0, 1, 1], [], []>} : vector<64x128xf32>, vector<128x768xf32>, vector<64x768xf32> -> vector<64x768xf32>
    %c0_29 = arith.constant 0 : index
    %c0_30 = arith.constant 0 : index
    %43 = vector.load %arg9[%c0_29, %c0_30] : memref<1x768xf32, #tpu.memory_space<vmem>>, vector<1x768xf32>
    %44 = vector.broadcast %43 : vector<1x768xf32> to vector<64x768xf32>
    %45 = arith.addf %42, %44 : vector<64x768xf32>
    %c0_31 = arith.constant 0 : index
    %c0_32 = arith.constant 0 : index
    %46 = vector.load %arg10[%c0_31, %c0_32] : memref<64x768xf32, #tpu.memory_space<vmem>>, vector<64x768xf32>
    tpu.vector_store %arg10[%c0_31, %c0_32], %45 {strides = array<i32>} : memref<64x768xf32, #tpu.memory_space<vmem>>, vector<64x768xf32>,
    return
  }
  func.func @transform_0(%arg0: i32) -> (i32, i32) {
    %c0_i32 = arith.constant 0 : i32
    %c0_i32_0 = arith.constant 0 : i32
    return %arg0, %c0_i32 : i32, i32
  }
  func.func @transform_1(%arg0: i32) -> (i32, i32) {
    %c0_i32 = arith.constant 0 : i32
    %c0_i32_0 = arith.constant 0 : i32
    %c0_i32_1 = arith.constant 0 : i32
    return %c0_i32, %c0_i32_0 : i32, i32
  }
  func.func @transform_2(%arg0: i32) -> (i32, i32) {
    %c0_i32 = arith.constant 0 : i32
    %c0_i32_0 = arith.constant 0 : i32
    %c0_i32_1 = arith.constant 0 : i32
    return %c0_i32, %c0_i32_0 : i32, i32
  }
  func.func @transform_3(%arg0: i32) -> (i32, i32) {
    %c0_i32 = arith.constant 0 : i32
    %c0_i32_0 = arith.constant 0 : i32
    %c0_i32_1 = arith.constant 0 : i32
    return %c0_i32, %c0_i32_0 : i32, i32
  }
  func.func @transform_4(%arg0: i32) -> (i32, i32) {
    %c0_i32 = arith.constant 0 : i32
    %c0_i32_0 = arith.constant 0 : i32
    %c0_i32_1 = arith.constant 0 : i32
    return %c0_i32, %c0_i32_0 : i32, i32
  }
  func.func @transform_5(%arg0: i32) -> (i32, i32) {
    %c0_i32 = arith.constant 0 : i32
    %c0_i32_0 = arith.constant 0 : i32
    %c0_i32_1 = arith.constant 0 : i32
    return %c0_i32, %c0_i32_0 : i32, i32
  }
  func.func @transform_6(%arg0: i32) -> (i32, i32) {
    %c0_i32 = arith.constant 0 : i32
    %c0_i32_0 = arith.constant 0 : i32
    %c0_i32_1 = arith.constant 0 : i32
    return %c0_i32, %c0_i32_0 : i32, i32
  }
  func.func @transform_7(%arg0: i32) -> (i32, i32) {
    %c0_i32 = arith.constant 0 : i32
    %c0_i32_0 = arith.constant 0 : i32
    %c0_i32_1 = arith.constant 0 : i32
    return %c0_i32, %c0_i32_0 : i32, i32
  }
  func.func @transform_8(%arg0: i32) -> (i32, i32) {
    %c0_i32 = arith.constant 0 : i32
    %c0_i32_0 = arith.constant 0 : i32
    %c0_i32_1 = arith.constant 0 : i32
    return %c0_i32, %c0_i32_0 : i32, i32
  }
  func.func @transform_9(%arg0: i32) -> (i32, i32) {
    %c0_i32 = arith.constant 0 : i32
    %c0_i32_0 = arith.constant 0 : i32
    return %arg0, %c0_i32 : i32, i32
  }
}

</mosaic_0001>

<bundles_post_ra>
// kernel: tpu_custom_call.1
= control target key start
LH: loop header
LB: loop body
LE: loop exit
PB: predicated region body
PF: predicated region fallthrough
CT: control target
= control target key end

     0   :  { %14 = vsyncpa [#allocation3], 0  ;;  %s2354_s0 = inlined_call_operand.vmem [shape: f32[64,32], index: 0, kind: input, shape index: {}]   ;;  %s2355_s1 = inlined_call_operand.vmem [shape: f32[32,128], index: 1, kind: input, shape index: {}]   ;;  %s2356_s2 = inlined_call_operand.vmem [shape: f32[1,128], index: 2, kind: input, shape index: {}]   ;;  %s2357_s3 = inlined_call_operand.vmem [shape: f32[8,64], index: 3, kind: input, shape index: {}]   ;;  %s2358_s4 = inlined_call_operand.vmem [shape: f32[64,8], index: 4, kind: input, shape index: {}]   ;;  %s2359_s5 = inlined_call_operand.vmem [shape: f32[128,8], index: 5, kind: input, shape index: {}]   ;;  %s2360_s6 = inlined_call_operand.vmem [shape: f32[8,128], index: 6, kind: input, shape index: {}]   ;;  %s2361_s7 = inlined_call_operand.hbm [shape: f32[128,768], index: 7, kind: input, shape index: {}]   ;;  %s2362_s8 = inlined_call_operand.vmem [shape: f32[1,768], index: 8, kind: input, shape index: {}]   ;;  %s2363_s9 = inlined_call_operand.hbm [shape: f32[64,768], index: 9, kind: output, shape index: {}]  }
   0x1   :  { %15 = vsyncpa [#allocation4], 0  ;;  %s1877_s30 = smov [#allocation2]   ;;  %s1829_s13 = scalar_lea.hbm %s2361_s7, 12288 }
   0x2   :  { %s35_s10 = sshll.u32 %s1877_s30, 4  ;;  %p1830_p0 = scmp.ne.s32.totalorder %s2361_s7, %s1829_s13  ;;  %s36_s10 = int_to_ptr.vmem [resolvable:$true] %s35_s10 }
   0x3   :  { %p1833_p1 = scmp.lt.u32.totalorder %s1829_s13, %s2361_s7 }
   0x5   :  { %p1835_p2 = pnand %p1833_p1, %p1830_p0 }
   0x7   :  { %1838 = shalt.err (!%p1835_p2)
}
   0x8   :  { %s1839_s18 = scalar_lea.vmem %s36_s10, 12288  ;;  %p1844_p4 = scmp.lt.s32.totalorder %s36_s10, %s36_s10 }
   0x9   :  { %p1840_p3 = scmp.ne.s32.totalorder %s36_s10, %s1839_s18  ;;  %p1845_p5 = scmp.lt.s32.totalorder %s1839_s18, %s1839_s18 }
   0xb   :  { %p1846_p6 = por %p1845_p5, %p1844_p4 }
   0xd   :  { %p1847_p7 = pnand %p1846_p6, %p1840_p3 }
   0xf   :  { %1850 = shalt.err (!%p1847_p7)
}
  0x10   :  { %s1878_s19 = smov 768   ;;  %s1879_s20 = smov 48  }
  0x11   :  { %41 = dma.hbm_to_vmem [thread:$0]  %s2361_s7, 12288, %s36_s10, [#allocation3], %s1878_s19, %s1878_s19, %s1879_s20  }
  0x12   :  { %1873 = dma.done.wait [#allocation3], 12288  }
  0x13   :  { %1874 = vsyncadd [#allocation3], 4294955008  ;;  %vm59_vm0 = vcmask 261120   ;;  %v55_v0 = vld [vmem:[%s2355_s1] sm:$0xff]  ;;  %v56_v1 = vld [vmem:[%s2355_s1 + $0x8] sm:$0xff]  ;;  %v1880_v14 = vmov 0.0|0.0  }
  0x14   :  { %v57_v2 = vld [vmem:[%s2355_s1 + $0x10] sm:$0xff]  ;;  %v1628_v3 = vpack.c.bf16 %v56_v1, %v55_v0  ;;  %v58_v4 = vld [vmem:[%s2355_s1 + $0x18] sm:$0xff]  ;;  %v47_v5 = vld [vmem:[%s2354_s0] sm:$0xff]  ;;  %1660 = vmatprep.subr.bf16.mxu1 %v1880_v14  ;;  %vm1881_vm1 = vmmov 0   ;;  %v1882_v15 = vmov 0.0   ;;  %vm206_vm2 = vcmask 523264  }
  0x15   :  { %v1632_v6 = vpack.c.bf16 %v58_v4, %v57_v2  ;;  %1498 = vmatprep.mubr.msk.f32.mxu0 %vm59_vm0, %v47_v5  ;;  %v48_v7 = vld [vmem:[%s2354_s0 + $0x8] sm:$0xff]  ;;  %v49_v8 = vld [vmem:[%s2354_s0 + $0x10] sm:$0xff]  ;;  %v50_v9 = vld [vmem:[%s2354_s0 + $0x18] sm:$0xff]  ;;  %1580 = vmatprep.mubr.msk.f32.mxu1 %vm1881_vm1, %v1882_v15  ;;  %vm505_vm3 = vcmask 64512  }
  0x16   :  { %1629 = vmatprep.subr.bf16.mxu0 %v1628_v3  ;;  %v51_v10 = vld [vmem:[%s2354_s0 + $0x20] sm:$0xff]  ;;  %v52_v11 = vld [vmem:[%s2354_s0 + $0x28] sm:$0xff]  ;;  %v53_v12 = vld [vmem:[%s2354_s0 + $0x30] sm:$0xff] }
  0x17   :  { %1631 = vmatpush3.bf16.msra.mxu0 %v1628_v3  ;;  %v54_v13 = vld [vmem:[%s2354_s0 + $0x38] sm:$0xff]  ;;  %v190_v16 = vld [vmem:[%s2359_s5] sm:$0xff]  ;;  %v191_v17 = vld [vmem:[%s2359_s5 + $0x8] sm:$0xff] }
  0x18   :  { %1633 = vmatprep.subr.bf16.mxu0 %v1632_v6  ;;  %v192_v18 = vld [vmem:[%s2359_s5 + $0x10] sm:$0xff]  ;;  %v2008_v19 = vpack.c.bf16 %v191_v17, %v190_v16  ;;  %v193_v20 = vld [vmem:[%s2359_s5 + $0x18] sm:$0xff]  ;;  %v194_v22 = vld [vmem:[%s2359_s5 + $0x20] sm:$0xff] }
  0x19   :  { %v2014_v21 = vpack.c.bf16 %v193_v20, %v192_v18  ;;  %v195_v23 = vld [vmem:[%s2359_s5 + $0x28] sm:$0xff]  ;;  %v196_v25 = vld [vmem:[%s2359_s5 + $0x30] sm:$0xff]  ;;  %v197_v26 = vld [vmem:[%s2359_s5 + $0x38] sm:$0xff] }
  0x1a   :  { %1662 = vmatpush3.bf16.msra.mxu1 %v2008_v19  ;;  %v2024_v24 = vpack.c.bf16 %v195_v23, %v194_v22  ;;  %v2034_v27 = vpack.c.bf16 %v197_v26, %v196_v25  ;;  %v198_v28 = vld [vmem:[%s2359_s5 + $0x40] sm:$0xff]  ;;  %v199_v29 = vld [vmem:[%s2359_s5 + $0x48] sm:$0xff]  ;;  %v200_v31 = vld [vmem:[%s2359_s5 + $0x50] sm:$0xff] }
  0x1b   :  { %1635 = vmatpush3.bf16.msra.mxu0 %v1632_v6  ;;  %1663 = vmatprep.subr.bf16.mxu1 %v1880_v14  ;;  %v2044_v30 = vpack.c.bf16 %v199_v29, %v198_v28  ;;  %v201_v32 = vld [vmem:[%s2359_s5 + $0x58] sm:$0xff]  ;;  %v202_v34 = vld [vmem:[%s2359_s5 + $0x60] sm:$0xff]  ;;  %v203_v35 = vld [vmem:[%s2359_s5 + $0x68] sm:$0xff] }
  0x1c   :  { %1636 = vmatprep.subr.bf16.mxu0 %v1880_v14  ;;  %v2054_v33 = vpack.c.bf16 %v201_v32, %v200_v31  ;;  %v2064_v36 = vpack.c.bf16 %v203_v35, %v202_v34  ;;  %v204_v37 = vld [vmem:[%s2359_s5 + $0x70] sm:$0xff]  ;;  %v205_v38 = vld [vmem:[%s2359_s5 + $0x78] sm:$0xff]  ;;  %v189_v0 = vld [vmem:[%s2357_s3] sm:$0xff] }
  0x1d   :  { %v2074_v39 = vpack.c.bf16 %v205_v38, %v204_v37  ;;  %v504_v5 = vld [vmem:[%s2360_s6] sm:$0xff]  ;;  %v870_v18 = vld [vmem:[#allocation2 + $0x8] sm:$0xff]  ;;  %v875_v22 = vld [vmem:[#allocation2 + $0x30] sm:$0xff] }
  0x1e   :  { %1499 = vmatmul.mubr.msk.f32.vlgmr.msra.gmra.mrb[0].mxu0 %vm59_vm0, %v48_v7  ;;  %1665 = vmatpush3.bf16.msra.mxu1 %v2014_v21  ;;  %v888_v25 = vld [vmem:[#allocation2 + $0x98] sm:$0xff]  ;;  %v887_v28 = vld [vmem:[#allocation2 + $0x90] sm:$0xff]  ;;  %v878_v32 = vld [vmem:[#allocation2 + $0x48] sm:$0xff] }
  0x1f   :  { %1501 = vmatprep.mubr.msk.f32.mxu0 %vm59_vm0, %v49_v8  ;;  %1666 = vmatprep.subr.bf16.mxu1 %v1880_v14  ;;  %v872_v31 = vld [vmem:[#allocation2 + $0x18] sm:$0xff]  ;;  %v871_v34 = vld [vmem:[#allocation2 + $0x10] sm:$0xff]  ;;  %v877_v35 = vld [vmem:[#allocation2 + $0x40] sm:$0xff] }
  0x20   :  { %v890_v37 = vld [vmem:[#allocation2 + $0xa8] sm:$0xff]  ;;  %v1740_v38 = vpack.c.bf16 %v878_v32, %v872_v31  ;;  %v919_v32 = vld [vmem:[#allocation2 + $0x190] sm:$0xff] }
  0x22   :  { %1502 = vmatmul.mubr.msk.f32.gmra.mrb[2].mxu0 %vm59_vm0, %v50_v9  ;;  %1668 = vmatpush3.bf16.msra.mxu1 %v2024_v24 }
  0x23   :  { %1504 = vmatprep.mubr.msk.f32.mxu0 %vm59_vm0, %v51_v10  ;;  %1669 = vmatprep.subr.bf16.mxu1 %v1880_v14 }
  0x26   :  { %1505 = vmatmul.mubr.msk.f32.gmra.mrb[4].mxu0 %vm59_vm0, %v52_v11  ;;  %1671 = vmatpush3.bf16.msra.mxu1 %v2034_v27 }
  0x27   :  { %1507 = vmatprep.mubr.msk.f32.mxu0 %vm59_vm0, %v53_v12  ;;  %1672 = vmatprep.subr.bf16.mxu1 %v1880_v14 }
  0x2a   :  { %1508 = vmatmul.mubr.msk.f32.gmra.mrb[6].mxu0 %vm59_vm0, %v54_v13  ;;  %1674 = vmatpush3.bf16.msra.mxu1 %v2044_v30 }
  0x2b   :  { %1526 = vmatprep.mubr.msk.f32.mxu0 %vm1881_vm1, %v1882_v15  ;;  %1675 = vmatprep.subr.bf16.mxu1 %v1880_v14 }
  0x2e   :  { %1677 = vmatpush3.bf16.msra.mxu1 %v2054_v33 }
  0x2f   :  { %1678 = vmatprep.subr.bf16.mxu1 %v1880_v14 }
  0x32   :  { %1680 = vmatpush3.bf16.msra.mxu1 %v2064_v36 }
  0x33   :  { %1681 = vmatprep.subr.bf16.mxu1 %v1880_v14 }
  0x36   :  { %1683 = vmatpush3.bf16.msra.mxu1 %v2074_v39 }
  0x37   :  { %1618 = vmatprep.subr.mxu1 %v1882_v15 }
  0xf1   :  { %v2079_v40 = vpop.f32.mrb[0].mxu0 }
  0xf2   :  { %v281_v41 = vmul.f32 %v2079_v40, %v2079_v40  ;;  %v2083_v42 = vpop.f32.mrb[1].mxu0 }
  0xf3   :  { %v1637_v43 = vpack.c.bf16 %v2079_v40, %v2083_v42  ;;  %v280_v44 = vmul.f32 %v2083_v42, %v2083_v42 }
  0xf5   :  { %v1649_v45 = vpack.c.bf16 %v281_v41, %v280_v44  ;;  %v2089_v46 = vpop.f32.mrb[2].mxu0  ;;  %1638 = vmatpush3.bf16.msra.mxu0 %v1637_v43  ;;  %v653_v41 = vld [vmem:[%s2358_s4] sm:$0xff]  ;;  %v1742_v43 = vpack.c.bf16 %v877_v35, %v871_v34  ;;  %v930_v35 = vld [vmem:[#allocation2 + $0x1e8] sm:$0xff] }
  0xf6   :  { %v283_v47 = vmul.f32 %v2089_v46, %v2089_v46  ;;  %v2093_v48 = vpop.f32.mrb[3].mxu0  ;;  %1639 = vmatprep.subr.bf16.mxu0 %v1880_v14 }
  0xf7   :  { %v1640_v49 = vpack.c.bf16 %v2089_v46, %v2093_v48  ;;  %v282_v50 = vmul.f32 %v2093_v48, %v2093_v48 }
  0xf9   :  { %v1652_v51 = vpack.c.bf16 %v283_v47, %v282_v50  ;;  %v2100_v52 = vpop.f32.mrb[4].mxu0  ;;  %1641 = vmatpush3.bf16.msra.mxu0 %v1640_v49  ;;  %v883_v47 = vld [vmem:[#allocation2 + $0x70] sm:$0xff]  ;;  %v889_v49 = vld [vmem:[#allocation2 + $0xa0] sm:$0xff]  ;;  %v654_v50 = vld [vmem:[%s2358_s4 + $0x8] sm:$0xff] }
  0xfa   :  { %v285_v53 = vmul.f32 %v2100_v52, %v2100_v52  ;;  %v2104_v54 = vpop.f32.mrb[5].mxu0  ;;  %1642 = vmatprep.subr.bf16.mxu0 %v1880_v14 }
  0xfb   :  { %v1643_v55 = vpack.c.bf16 %v2100_v52, %v2104_v54  ;;  %v284_v56 = vmul.f32 %v2104_v54, %v2104_v54 }
  0xfd   :  { %v1655_v57 = vpack.c.bf16 %v285_v53, %v284_v56  ;;  %v2111_v58 = vpop.f32.mrb[6].mxu0  ;;  %1644 = vmatpush3.bf16.msra.mxu0 %v1643_v55  ;;  %v655_v53 = vld [vmem:[%s2358_s4 + $0x10] sm:$0xff]  ;;  %v656_v55 = vld [vmem:[%s2358_s4 + $0x18] sm:$0xff]  ;;  %v657_v56 = vld [vmem:[%s2358_s4 + $0x20] sm:$0xff] }
  0xfe   :  { %v287_v59 = vmul.f32 %v2111_v58, %v2111_v58  ;;  %v2115_v60 = vpop.f32.mrb[7].mxu0  ;;  %1645 = vmatprep.subr.bf16.mxu0 %v1880_v14 }
  0xff   :  { %v1646_v61 = vpack.c.bf16 %v2111_v58, %v2115_v60  ;;  %v286_v62 = vmul.f32 %v2115_v60, %v2115_v60 }
 0x101   :  { %v1658_v63 = vpack.c.bf16 %v287_v59, %v286_v62  ;;  %1647 = vmatpush3.bf16.msra.mxu0 %v1646_v61  ;;  %v659_v59 = vld [vmem:[%s2358_s4 + $0x30] sm:$0xff]  ;;  %v660_v61 = vld [vmem:[%s2358_s4 + $0x38] sm:$0xff]  ;;  %v894_v62 = vld [vmem:[#allocation2 + $0xc8] sm:$0xff] }
 0x102   :  { %1648 = vmatprep.subr.bf16.mxu0 %v1880_v14 }
 0x104   :  { %1527 = vmatmul.mubr.msk.f32.vlgmr.msra.gmra.mrb[8].mxu0 %vm206_vm2, %v189_v0 }
 0x105   :  { %1650 = vmatpush3.bf16.msra.mxu0 %v1649_v45  ;;  %1545 = vmatprep.mubr.msk.f32.mxu0 %vm1881_vm1, %v1882_v15 }
 0x106   :  { %1651 = vmatprep.subr.bf16.mxu0 %v1880_v14 }
 0x109   :  { %1653 = vmatpush3.bf16.msra.mxu0 %v1652_v51  ;;  %v1746_v51 = vpack.c.bf16 %v889_v49, %v883_v47  ;;  %v931_v47 = vld [vmem:[#allocation2 + $0x1f0] sm:$0xff]  ;;  %v937_v49 = vld [vmem:[#allocation2 + $0x220] sm:$0xff] }
 0x10a   :  { %1654 = vmatprep.subr.bf16.mxu0 %v1880_v14 }
 0x10d   :  { %1656 = vmatpush3.bf16.msra.mxu0 %v1655_v57  ;;  %v658_v57 = vld [vmem:[%s2358_s4 + $0x28] sm:$0xff] }
 0x10e   :  { %1657 = vmatprep.subr.bf16.mxu0 %v1880_v14 }
 0x111   :  { %1659 = vmatpush3.bf16.msra.mxu0 %v1658_v63  ;;  %v900_v63 = vld [vmem:[#allocation2 + $0xf8] sm:$0xff] }
 0x112   :  { %1684 = vmatprep.subr.bf16.mxu0 %v1880_v14 }
 0x114   :  { %1546 = vmatmul.mubr.msk.f32.vlgmr.msra.gmra.mrb[10].mxu0 %vm206_vm2, %v189_v0  ;;  %v896_v0 = vld [vmem:[#allocation2 + $0xd8] sm:$0xff] }
 0x115   :  { %1686 = vmatpush3.bf16.msra.mxu0 %v2008_v19  ;;  %1615 = vmatprep.mubr.msk.f32.mxu0 %vm1881_vm1, %v1882_v15  ;;  %v876_v19 = vld [vmem:[#allocation2 + $0x38] sm:$0xff] }
 0x116   :  { %1687 = vmatprep.subr.bf16.mxu0 %v1880_v14  ;;  %v1708_v20 = vpack.c.bf16 %v876_v19, %v870_v18 }
 0x119   :  { %1689 = vmatpush3.bf16.msra.mxu0 %v2014_v21  ;;  %v869_v21 = vld [vmem:[#allocation2] sm:$0xff] }
 0x11a   :  { %1690 = vmatprep.subr.bf16.mxu0 %v1880_v14  ;;  %v1710_v23 = vpack.c.bf16 %v875_v22, %v869_v21  ;;  %v913_v21 = vld [vmem:[#allocation2 + $0x160] sm:$0xff] }
 0x11d   :  { %1692 = vmatpush3.bf16.msra.mxu0 %v2024_v24  ;;  %v882_v24 = vld [vmem:[#allocation2 + $0x68] sm:$0xff] }
 0x11e   :  { %1693 = vmatprep.subr.bf16.mxu0 %v1880_v14  ;;  %v1712_v26 = vpack.c.bf16 %v888_v25, %v882_v24  ;;  %v924_v24 = vld [vmem:[#allocation2 + $0x1b8] sm:$0xff] }
 0x11f   :  { %v920_v25 = vld [vmem:[#allocation2 + $0x198] sm:$0xff] }
 0x121   :  { %1695 = vmatpush3.bf16.msra.mxu0 %v2034_v27  ;;  %v881_v27 = vld [vmem:[#allocation2 + $0x60] sm:$0xff] }
 0x122   :  { %1696 = vmatprep.subr.bf16.mxu0 %v1880_v14  ;;  %v1714_v29 = vpack.c.bf16 %v887_v28, %v881_v27  ;;  %v926_v27 = vld [vmem:[#allocation2 + $0x1c8] sm:$0xff]  ;;  %v917_v28 = vld [vmem:[#allocation2 + $0x180] sm:$0xff] }
 0x125   :  { %1698 = vmatpush3.bf16.msra.mxu0 %v2044_v30 }
 0x126   :  { %1699 = vmatprep.subr.bf16.mxu0 %v1880_v14 }
 0x129   :  { %1701 = vmatpush3.bf16.msra.mxu0 %v2054_v33 }
 0x12a   :  { %1702 = vmatprep.subr.bf16.mxu0 %v1880_v14 }
 0x12d   :  { %1704 = vmatpush3.bf16.msra.mxu0 %v2064_v36  ;;  %v884_v36 = vld [vmem:[#allocation2 + $0x78] sm:$0xff] }
 0x12e   :  { %1705 = vmatprep.subr.bf16.mxu0 %v1880_v14  ;;  %v1744_v45 = vpack.c.bf16 %v890_v37, %v884_v36  ;;  %v936_v36 = vld [vmem:[#allocation2 + $0x218] sm:$0xff] }
 0x12f   :  { %v932_v37 = vld [vmem:[#allocation2 + $0x1f8] sm:$0xff] }
 0x131   :  { %1707 = vmatpush3.bf16.msra.mxu0 %v2074_v39 }
 0x1d7   :  { %v276_v1 = vpop.f32.mrb[8].mxu0 }
 0x1d8   :  { %v1528_v2 = vpop.f32.mrb[9].mxu0  ;;  %1581 = vmatmul.mubr.f32.vlgmr.msra.gmra.mrb[0].mxu1 %v276_v1  ;;  %v1716_v1 = vpack.c.bf16 %v900_v63, %v894_v62 }
 0x1d9   :  { %1620 = vmatprep.mubr.msk.f32.mxu1 %vm1881_vm1, %v1882_v15  ;;  %1619 = vmatpush3.msra.mxu1 %v504_v5  ;;  %v902_v2 = vld [vmem:[#allocation2 + $0x108] sm:$0xff] }
 0x1da   :  { %1623 = vmatprep.subr.mxu1 %v1882_v15 }
 0x1e7   :  { %v354_v3 = vpop.f32.mrb[10].mxu0 }
 0x1e8   :  { %v1547_v4 = vpop.f32.mrb[11].mxu0  ;;  %1616 = vmatmul.mubr.f32.vlgmr.msra.gmra.mrb[12].mxu0 %v354_v3  ;;  %v893_v3 = vld [vmem:[#allocation2 + $0xc0] sm:$0xff] }
 0x1e9   :  { %749 = vmatprep.mubr.f32.mxu0 %v1882_v15  ;;  %v899_v4 = vld [vmem:[#allocation2 + $0xf0] sm:$0xff] }
 0x2ab   :  { %v424_v6 = vpop.f32.mrb[0].mxu1 }
 0x2ac   :  { %v1582_v7 = vpop.f32.mrb[1].mxu1  ;;  %v428_v8 = vmul.f32 0.001953125, %v424_v6  ;;  %v1718_v6 = vpack.c.bf16 %v899_v4, %v893_v3  ;;  %v954_v3 = vld [vmem:[#allocation2 + $0x2a8] sm:$0xff]  ;;  %v960_v4 = vld [vmem:[#allocation2 + $0x2d8] sm:$0xff] }
 0x2ad   :  { %v895_v7 = vld [vmem:[#allocation2 + $0xd0] sm:$0xff] }
 0x2ae   :  { %v500_v10 = vmul.f32 %v428_v8, %v428_v8 }
 0x2bb   :  { %v495_v9 = vpop.f32.mrb[12].mxu0 }
 0x2bc   :  { %v499_v11 = vmul.f32 0.001953125, %v495_v9  ;;  %v1617_v12 = vpop.f32.mrb[13].mxu0 }
 0x2bd   :  { %v908_v12 = vld [vmem:[#allocation2 + $0x138] sm:$0xff] }
 0x2be   :  { %v501_v13 = vsub.f32 %v499_v11, %v500_v10  ;;  %v906_v10 = vld [vmem:[#allocation2 + $0x128] sm:$0xff]  ;;  %v912_v11 = vld [vmem:[#allocation2 + $0x158] sm:$0xff] }
 0x2c0   :  { %v502_v14 = vadd.f32 1e-05, %v501_v13  ;;  %v1720_v13 = vpack.c.bf16 %v912_v11, %v906_v10 }
 0x2c2   :  { %1811 = vrsqrt.f32 %v502_v14  ;;  %v914_v14 = vld [vmem:[#allocation2 + $0x168] sm:$0xff] }
 0x2c3   :  { %v1752_v18 = vpack.c.bf16 %v914_v14, %v908_v12  ;;  %v955_v12 = vld [vmem:[#allocation2 + $0x2b0] sm:$0xff] }
 0x2cc   :  { %v1812_v16 = vpop.eup %1811 }
 0x2cd   :  { %1621 = vmatmul.mubr.msk.f32.vlgmr.msra.gmra.mrb[2].mxu1 %vm505_vm3, %v1812_v16  ;;  %v579_v17 = vmul.f32 %v1812_v16, %v428_v8  ;;  %v901_v8 = vld [vmem:[#allocation2 + $0x100] sm:$0xff] }
 0x2ce   :  { %1624 = vmatpush3.msra.mxu1 %v504_v5  ;;  %1625 = vmatprep.mubr.msk.f32.mxu1 %vm1881_vm1, %v1882_v15  ;;  %v1748_v5 = vpack.c.bf16 %v902_v2, %v896_v0  ;;  %v1750_v9 = vpack.c.bf16 %v901_v8, %v895_v7  ;;  %v905_v16 = vld [vmem:[#allocation2 + $0x120] sm:$0xff]  ;;  %v943_v0 = vld [vmem:[#allocation2 + $0x250] sm:$0xff]  ;;  %v962_v7 = vld [vmem:[#allocation2 + $0x2e8] sm:$0xff] }
 0x2cf   :  { %1709 = vmatprep.subr.bf16.mxu1 %v1708_v20  ;;  %v907_v20 = vld [vmem:[#allocation2 + $0x130] sm:$0xff]  ;;  %v953_v8 = vld [vmem:[#allocation2 + $0x2a0] sm:$0xff] }
 0x2d0   :  { %v1754_v22 = vpack.c.bf16 %v913_v21, %v907_v20 }
 0x2d1   :  { %1626 = vmatmul.mubr.msk.f32.vlgmr.msra.gmra.mrb[4].mxu1 %vm505_vm3, %v579_v17  ;;  %v911_v17 = vld [vmem:[#allocation2 + $0x150] sm:$0xff] }
 0x2d2   :  { %1061 = vmatprep.mubr.f32.mxu1 %v1882_v15  ;;  %1711 = vmatpush1.bf16.msra.mxu1 %v1710_v23  ;;  %v1722_v19 = vpack.c.bf16 %v911_v17, %v905_v16  ;;  %v918_v23 = vld [vmem:[#allocation2 + $0x188] sm:$0xff]  ;;  %v880_v17 = vld [vmem:[#allocation2 + $0x58] sm:$0xff] }
 0x2d3   :  { %1713 = vmatprep.subr.bf16.mxu1 %v1712_v26  ;;  %v1724_v26 = vpack.c.bf16 %v924_v24, %v918_v23  ;;  %v874_v16 = vld [vmem:[#allocation2 + $0x28] sm:$0xff] }
 0x2d6   :  { %1715 = vmatpush1.bf16.msra.mxu1 %v1714_v29  ;;  %v923_v29 = vld [vmem:[#allocation2 + $0x1b0] sm:$0xff] }
 0x2d7   :  { %1717 = vmatprep.subr.bf16.mxu1 %v1716_v1  ;;  %v1726_v31 = vpack.c.bf16 %v923_v29, %v917_v28  ;;  %v949_v1 = vld [vmem:[#allocation2 + $0x280] sm:$0xff] }
 0x2d8   :  { %v1766_v2 = vpack.c.bf16 %v949_v1, %v943_v0  ;;  %v885_v1 = vld [vmem:[#allocation2 + $0x80] sm:$0xff] }
 0x2da   :  { %1719 = vmatpush1.bf16.msra.mxu1 %v1718_v6  ;;  %v1736_v6 = vpack.c.bf16 %v960_v4, %v954_v3 }
 0x2db   :  { %1721 = vmatprep.subr.bf16.mxu1 %v1720_v13  ;;  %v961_v13 = vld [vmem:[#allocation2 + $0x2e0] sm:$0xff] }
 0x2dc   :  { %v1770_v14 = vpack.c.bf16 %v961_v13, %v955_v12 }
 0x2de   :  { %1723 = vmatpush1.bf16.msra.mxu1 %v1722_v19 }
 0x2df   :  { %1725 = vmatprep.subr.bf16.mxu1 %v1724_v26 }
 0x2e2   :  { %1727 = vmatpush1.bf16.msra.mxu1 %v1726_v31 }
 0x3a0   :  { %v575_v30 = vpop.f32.mrb[2].mxu1 }
 0x3a1   :  { %v1622_v33 = vpop.f32.mrb[3].mxu1 }
 0x3a2   :  { %v925_v33 = vld [vmem:[#allocation2 + $0x1c0] sm:$0xff] }
 0x3a3   :  { %v1758_v34 = vpack.c.bf16 %v925_v33, %v919_v32 }
 0x3a4   :  { %v649_v39 = vpop.f32.mrb[4].mxu1 }
 0x3a5   :  { %v1627_v44 = vpop.f32.mrb[5].mxu1  ;;  %685 = vmatprep.subr.mxu0 %v649_v39  ;;  %v938_v39 = vld [vmem:[#allocation2 + $0x228] sm:$0xff] }
 0x3a6   :  { %686 = vmatpush1.msra.mxu0 %v575_v30  ;;  %v1756_v30 = vpack.c.bf16 %v926_v27, %v920_v25  ;;  %v1760_v44 = vpack.c.bf16 %v938_v39, %v932_v37 }
 0x3a7   :  { %1413 = vmatmul.mubr.msk.f32.vlgmr.msra.gmra.mrb[14].mxu0 %vm505_vm3, %v653_v41  ;;  %1741 = vmatprep.subr.bf16.mxu0 %v1740_v38  ;;  %v1728_v38 = vpack.c.bf16 %v936_v36, %v930_v35  ;;  %v929_v41 = vld [vmem:[#allocation2 + $0x1e0] sm:$0xff] }
 0x3a8   :  { %755 = vmatprep.mubr.f32.mxu0 %v1882_v15  ;;  %1743 = vmatpush1.bf16.msra.mxu0 %v1742_v43  ;;  %v935_v43 = vld [vmem:[#allocation2 + $0x210] sm:$0xff] }
 0x3a9   :  { %1745 = vmatprep.subr.bf16.mxu0 %v1744_v45  ;;  %v1730_v45 = vpack.c.bf16 %v935_v43, %v929_v41  ;;  %1729 = vmatprep.subr.bf16.mxu1 %v1728_v38 }
 0x3ab   :  { %1414 = vmatmul.mubr.msk.f32.gmra.mrb[16].mxu0 %vm505_vm3, %v654_v50  ;;  %v1762_v50 = vpack.c.bf16 %v937_v49, %v931_v47  ;;  %1731 = vmatpush1.bf16.msra.mxu1 %v1730_v45  ;;  %v873_v45 = vld [vmem:[#allocation2 + $0x20] sm:$0xff]  ;;  %v879_v47 = vld [vmem:[#allocation2 + $0x50] sm:$0xff] }
 0x3ac   :  { %761 = vmatprep.mubr.f32.mxu0 %v1882_v15  ;;  %1747 = vmatpush1.bf16.msra.mxu0 %v1746_v51  ;;  %v942_v51 = vld [vmem:[#allocation2 + $0x248] sm:$0xff] }
 0x3ad   :  { %1749 = vmatprep.subr.bf16.mxu0 %v1748_v5  ;;  %v956_v5 = vld [vmem:[#allocation2 + $0x2b8] sm:$0xff] }
 0x3ae   :  { %v1768_v10 = vpack.c.bf16 %v962_v7, %v956_v5  ;;  %v904_v7 = vld [vmem:[#allocation2 + $0x118] sm:$0xff] }
 0x3af   :  { %1415 = vmatmul.mubr.msk.f32.gmra.mrb[18].mxu0 %vm505_vm3, %v655_v53  ;;  %v948_v53 = vld [vmem:[#allocation2 + $0x278] sm:$0xff] }
 0x3b0   :  { %767 = vmatprep.mubr.f32.mxu0 %v1882_v15  ;;  %1751 = vmatpush1.bf16.msra.mxu0 %v1750_v9  ;;  %v959_v9 = vld [vmem:[#allocation2 + $0x2d0] sm:$0xff] }
 0x3b1   :  { %1753 = vmatprep.subr.bf16.mxu0 %v1752_v18  ;;  %v1738_v11 = vpack.c.bf16 %v959_v9, %v953_v8  ;;  %v1772_v18 = vpack.c.bf16 %v880_v17, %v874_v16  ;;  %v897_v17 = vld [vmem:[#allocation2 + $0xe0] sm:$0xff] }
 0x3b3   :  { %1416 = vmatmul.mubr.msk.f32.gmra.mrb[20].mxu0 %vm505_vm3, %v656_v55  ;;  %v944_v55 = vld [vmem:[#allocation2 + $0x258] sm:$0xff] }
 0x3b4   :  { %773 = vmatprep.mubr.f32.mxu0 %v1882_v15  ;;  %1755 = vmatpush1.bf16.msra.mxu0 %v1754_v22  ;;  %v2205_v22 = vld [vmem:[%s2356_s2] ss:$0 sm:$0xff] }
 0x3b5   :  { %1757 = vmatprep.subr.bf16.mxu0 %v1756_v30 }
 0x3b7   :  { %1417 = vmatmul.mubr.msk.f32.gmra.mrb[22].mxu0 %vm505_vm3, %v657_v56  ;;  %v1732_v56 = vpack.c.bf16 %v948_v53, %v942_v51  ;;  %v886_v53 = vld [vmem:[#allocation2 + $0x88] sm:$0xff] }
 0x3b8   :  { %779 = vmatprep.mubr.f32.mxu0 %v1882_v15  ;;  %1759 = vmatpush1.bf16.msra.mxu0 %v1758_v34 }
 0x3b9   :  { %1761 = vmatprep.subr.bf16.mxu0 %v1760_v44  ;;  %1733 = vmatprep.subr.bf16.mxu1 %v1732_v56 }
 0x3bb   :  { %1418 = vmatmul.mubr.msk.f32.gmra.mrb[24].mxu0 %vm505_vm3, %v658_v57  ;;  %v950_v57 = vld [vmem:[#allocation2 + $0x288] sm:$0xff] }
 0x3bc   :  { %785 = vmatprep.mubr.f32.mxu0 %v1882_v15  ;;  %1763 = vmatpush1.bf16.msra.mxu0 %v1762_v50  ;;  %v1764_v62 = vpack.c.bf16 %v950_v57, %v944_v55  ;;  %v892_v55 = vld [vmem:[#allocation2 + $0xb8] sm:$0xff] }
 0x3bd   :  { %v1776_v0 = vpack.c.bf16 %v892_v55, %v886_v53 }
 0x3be   :  { %1765 = vmatprep.subr.bf16.mxu0 %v1764_v62 }
 0x3bf   :  { %1419 = vmatmul.mubr.msk.f32.gmra.mrb[26].mxu0 %vm505_vm3, %v659_v59  ;;  %v941_v59 = vld [vmem:[#allocation2 + $0x240] sm:$0xff] }
 0x3c0   :  { %791 = vmatprep.mubr.f32.mxu0 %v1882_v15  ;;  %1767 = vmatpush1.bf16.msra.mxu0 %v1766_v2  ;;  %v891_v2 = vld [vmem:[#allocation2 + $0xb0] sm:$0xff] }
 0x3c1   :  { %1769 = vmatprep.subr.bf16.mxu0 %v1768_v10  ;;  %v1778_v13 = vpack.c.bf16 %v891_v2, %v885_v1 }
 0x3c3   :  { %1420 = vmatmul.mubr.msk.f32.gmra.mrb[28].mxu0 %vm505_vm3, %v660_v61  ;;  %v947_v61 = vld [vmem:[#allocation2 + $0x270] sm:$0xff] }
 0x3c4   :  { %1174 = vmatprep.mubr.f32.mxu0 %v1882_v15  ;;  %v1734_v63 = vpack.c.bf16 %v947_v61, %v941_v59  ;;  %1771 = vmatpush1.bf16.msra.mxu0 %v1770_v14 }
 0x3c6   :  { %1735 = vmatpush1.bf16.msra.mxu1 %v1734_v63 }
 0x3c7   :  { %1737 = vmatprep.subr.bf16.mxu1 %v1736_v6  ;;  %v898_v6 = vld [vmem:[#allocation2 + $0xe8] sm:$0xff] }
 0x3c8   :  { %v1780_v16 = vpack.c.bf16 %v904_v7, %v898_v6  ;;  %v951_v6 = vld [vmem:[#allocation2 + $0x290] sm:$0xff] }
 0x3ca   :  { %1739 = vmatpush1.bf16.msra.mxu1 %v1738_v11 }
 0x3cb   :  { %1773 = vmatprep.subr.bf16.mxu1 %v1772_v18  ;;  %v903_v18 = vld [vmem:[#allocation2 + $0x110] sm:$0xff] }
 0x47a   :  { %v751_v19 = vpop.f32.mrb[14].mxu0 }
 0x47b   :  { %v798_v20 = vmul.f32 %v751_v19, %v2083_v42  ;;  %v753_v21 = vpop.f32.mrb[15].mxu0 }
 0x47d   :  { %v806_v23 = vsub.f32 %v798_v20, %v753_v21 }
 0x47e   :  { %v757_v24 = vpop.f32.mrb[16].mxu0 }
 0x47f   :  { %v821_v25 = vadd.f32 %v2205_v22, %v806_v23  ;;  %v799_v26 = vmul.f32 %v2079_v40, %v757_v24  ;;  %v759_v27 = vpop.f32.mrb[17].mxu0  ;;  %v910_v23 = vld [vmem:[#allocation2 + $0x148] sm:$0xff]  ;;  %v916_v24 = vld [vmem:[#allocation2 + $0x178] sm:$0xff] }
 0x481   :  { %v837_v28 = vmul.f32 0.70710677, %v821_v25  ;;  %v807_v29 = vsub.f32 %v799_v26, %v759_v27 }
 0x482   :  { %v763_v30 = vpop.f32.mrb[18].mxu0 }
 0x483   :  { %1813 = verf.f32 %v837_v28  ;;  %v822_v31 = vadd.f32 %v2205_v22, %v807_v29  ;;  %v800_v42 = vmul.f32 %v763_v30, %v2093_v48  ;;  %v765_v32 = vpop.f32.mrb[19].mxu0  ;;  %v1782_v30 = vpack.c.bf16 %v903_v18, %v897_v17  ;;  %v963_v17 = vld [vmem:[#allocation2 + $0x2f0] sm:$0xff] }
 0x485   :  { %v838_v33 = vmul.f32 0.70710677, %v822_v31  ;;  %v808_v34 = vsub.f32 %v800_v42, %v765_v32  ;;  %v830_v8 = vmul.f32 0.5, %v822_v31  ;;  %v1784_v42 = vpack.c.bf16 %v916_v24, %v910_v23  ;;  %v909_v32 = vld [vmem:[#allocation2 + $0x140] sm:$0xff] }
 0x486   :  { %v769_v35 = vpop.f32.mrb[20].mxu0 }
 0x487   :  { %1815 = verf.f32 %v838_v33  ;;  %v823_v36 = vadd.f32 %v2205_v22, %v808_v34  ;;  %v801_v37 = vmul.f32 %v2089_v46, %v769_v35  ;;  %v771_v38 = vpop.f32.mrb[21].mxu0  ;;  %v829_v46 = vmul.f32 0.5, %v821_v25  ;;  %v915_v33 = vld [vmem:[#allocation2 + $0x170] sm:$0xff] }
 0x489   :  { %v839_v40 = vmul.f32 0.70710677, %v823_v36  ;;  %v809_v39 = vsub.f32 %v801_v37, %v771_v38  ;;  %v922_v37 = vld [vmem:[#allocation2 + $0x1a8] sm:$0xff]  ;;  %v928_v38 = vld [vmem:[#allocation2 + $0x1d8] sm:$0xff] }
 0x48a   :  { %v775_v41 = vpop.f32.mrb[22].mxu0 }
 0x48b   :  { %1817 = verf.f32 %v839_v40  ;;  %v2214_v43 = vadd.f32 %v2205_v22, %v809_v39  ;;  %v802_v44 = vmul.f32 %v775_v41, %v2104_v54  ;;  %v777_v48 = vpop.f32.mrb[23].mxu0  ;;  %v1774_v54 = vpack.c.bf16 %v879_v47, %v873_v45  ;;  %v921_v45 = vld [vmem:[#allocation2 + $0x1a0] sm:$0xff] }
 0x48c   :  { %v1786_v41 = vpack.c.bf16 %v915_v33, %v909_v32 }
 0x48d   :  { %v1814_v49 = vpop.eup %1813  ;;  %v840_v50 = vmul.f32 0.70710677, %v2214_v43  ;;  %v810_v51 = vsub.f32 %v802_v44, %v777_v48  ;;  %v1788_v48 = vpack.c.bf16 %v928_v38, %v922_v37 }
 0x48e   :  { %v853_v56 = vadd.f32 1.0, %v1814_v49  ;;  %v781_v57 = vpop.f32.mrb[24].mxu0 }
 0x48f   :  { %1819 = verf.f32 %v840_v50  ;;  %v2219_v59 = vadd.f32 %v2205_v22, %v810_v51  ;;  %v803_v61 = vmul.f32 %v2100_v52, %v781_v57  ;;  %v783_v62 = vpop.f32.mrb[25].mxu0  ;;  %v934_v50 = vld [vmem:[#allocation2 + $0x208] sm:$0xff]  ;;  %v940_v51 = vld [vmem:[#allocation2 + $0x238] sm:$0xff]  ;;  %v933_v57 = vld [vmem:[#allocation2 + $0x200] sm:$0xff] }
 0x490   :  { %v2222_v63 = vmul.f32 %v853_v56, %v829_v46  ;;  %v1792_v56 = vpack.c.bf16 %v940_v51, %v934_v50 }
 0x491   :  { %v1816_v3 = vpop.eup %1815  ;;  %v841_v4 = vmul.f32 0.70710677, %v2219_v59  ;;  %v811_v5 = vsub.f32 %v803_v61, %v783_v62  ;;  %v833_v53 = vmul.f32 0.5, %v2219_v59  ;;  %v939_v61 = vld [vmem:[#allocation2 + $0x230] sm:$0xff]  ;;  %v952_v59 = vld [vmem:[#allocation2 + $0x298] sm:$0xff] }
 0x492   :  { %v787_v9 = vpop.f32.mrb[26].mxu0  ;;  %1062 = vmatmul.mubr.f32.vlgmr.msra.gmra.mrb[6].mxu1 %v2222_v63  ;;  %1175 = vmatmul.mubr.f32.vlgmr.msra.gmra.mrb[30].mxu0 %v2222_v63  ;;  %v854_v52 = vadd.f32 1.0, %v1816_v3  ;;  %v1794_v2 = vpack.c.bf16 %v939_v61, %v933_v57 }
 0x493   :  { %1821 = verf.f32 %v841_v4  ;;  %v2228_v10 = vadd.f32 %v2205_v22, %v811_v5  ;;  %v804_v11 = vmul.f32 %v787_v9, %v2115_v60  ;;  %1775 = vmatpush1.bf16.msra.mxu1 %v1774_v54  ;;  %v789_v12 = vpop.f32.mrb[27].mxu0  ;;  %1067 = vmatprep.mubr.f32.mxu1 %v1882_v15  ;;  %v831_v60 = vmul.f32 0.5, %v823_v36  ;;  %v946_v54 = vld [vmem:[#allocation2 + $0x268] sm:$0xff]  ;;  %v945_v5 = vld [vmem:[#allocation2 + $0x260] sm:$0xff]  ;;  %v964_v9 = vld [vmem:[#allocation2 + $0x2f8] sm:$0xff] }
 0x494   :  { %1180 = vmatprep.mubr.f32.mxu0 %v1882_v15  ;;  %v2233_v14 = vmul.f32 %v854_v52, %v830_v8  ;;  %1777 = vmatprep.subr.bf16.mxu1 %v1776_v0  ;;  %v1796_v4 = vpack.c.bf16 %v952_v59, %v946_v54  ;;  %v958_v8 = vld [vmem:[#allocation2 + $0x2c8] sm:$0xff] }
 0x495   :  { %v1818_v19 = vpop.eup %1817  ;;  %v842_v20 = vmul.f32 0.70710677, %v2228_v10  ;;  %v812_v21 = vsub.f32 %v804_v11, %v789_v12  ;;  %v834_v0 = vmul.f32 0.5, %v2228_v10  ;;  %v1798_v11 = vpack.c.bf16 %v951_v6, %v945_v5 }
 0x496   :  { %v793_v25 = vpop.f32.mrb[28].mxu0  ;;  %1068 = vmatmul.mubr.f32.gmra.mrb[8].mxu1 %v2233_v14  ;;  %1181 = vmatmul.mubr.f32.gmra.mrb[32].mxu0 %v2233_v14  ;;  %v855_v26 = vadd.f32 1.0, %v1818_v19 }
 0x497   :  { %1823 = verf.f32 %v842_v20  ;;  %v2239_v27 = vadd.f32 %v2205_v22, %v812_v21  ;;  %v805_v28 = vmul.f32 %v2111_v58, %v793_v25  ;;  %1779 = vmatpush1.bf16.msra.mxu1 %v1778_v13  ;;  %v795_v29 = vpop.f32.mrb[29].mxu0  ;;  %1073 = vmatprep.mubr.f32.mxu1 %v1882_v15  ;;  %v832_v58 = vmul.f32 0.5, %v2214_v43  ;;  %v927_v43 = vld [vmem:[#allocation2 + $0x1d0] sm:$0xff]  ;;  %v2287_v25 = vld [vmem:[%s2362_s8] sm:$0x3f]  ;;  %s1883_s8 = smov [#allocation5]  }
 0x498   :  { %1186 = vmatprep.mubr.f32.mxu0 %v1882_v15  ;;  %v2244_v31 = vmul.f32 %v855_v26, %v831_v60  ;;  %1781 = vmatprep.subr.bf16.mxu1 %v1780_v16  ;;  %v1790_v55 = vpack.c.bf16 %v927_v43, %v921_v45  ;;  %v1800_v13 = vpack.c.bf16 %v964_v9, %v958_v8  ;;  %v957_v16 = vld [vmem:[#allocation2 + $0x2c0] sm:$0xff]  ;;  %s1389_s10 = sshll.u32 %s1883_s8, 4  ;;  %s1390_s10 = int_to_ptr.vmem [resolvable:$true] %s1389_s10 }
 0x499   :  { %v1820_v34 = vpop.eup %1819  ;;  %v843_v35 = vmul.f32 0.70710677, %v2239_v27  ;;  %v813_v36 = vsub.f32 %v805_v28, %v795_v29  ;;  %v835_v52 = vmul.f32 0.5, %v2239_v27  ;;  %v1802_v21 = vpack.c.bf16 %v963_v17, %v957_v16  ;;  %s1851_s11 = scalar_lea.vmem %s1390_s10, 6144  ;;  %p1856_p9 = scmp.lt.s32.totalorder %s1390_s10, %s1390_s10 }
 0x49a   :  { %1074 = vmatmul.mubr.f32.gmra.mrb[10].mxu1 %v2244_v31  ;;  %1187 = vmatmul.mubr.f32.gmra.mrb[34].mxu0 %v2244_v31  ;;  %v856_v40 = vadd.f32 1.0, %v1820_v34  ;;  %p1852_p8 = scmp.ne.s32.totalorder %s1390_s10, %s1851_s11  ;;  %p1857_p10 = scmp.lt.s32.totalorder %s1851_s11, %s1851_s11 }
 0x49b   :  { %1825 = verf.f32 %v843_v35  ;;  %v828_v39 = vadd.f32 %v2205_v22, %v813_v36  ;;  %1783 = vmatpush1.bf16.msra.mxu1 %v1782_v30  ;;  %1079 = vmatprep.mubr.f32.mxu1 %v1882_v15 }
 0x49c   :  { %1192 = vmatprep.mubr.f32.mxu0 %v1882_v15  ;;  %v2253_v44 = vmul.f32 %v856_v40, %v832_v58  ;;  %1785 = vmatprep.subr.bf16.mxu1 %v1784_v42  ;;  %p1858_p11 = por %p1857_p10, %p1856_p9 }
 0x49d   :  { %v1822_v47 = vpop.eup %1821  ;;  %v844_v49 = vmul.f32 0.70710677, %v828_v39  ;;  %v836_v19 = vmul.f32 0.5, %v828_v39 }
 0x49e   :  { %1080 = vmatmul.mubr.f32.gmra.mrb[12].mxu1 %v2253_v44  ;;  %1193 = vmatmul.mubr.f32.gmra.mrb[36].mxu0 %v2253_v44  ;;  %v857_v22 = vadd.f32 1.0, %v1822_v47  ;;  %p1859_p12 = pnand %p1858_p11, %p1852_p8 }
 0x49f   :  { %1827 = verf.f32 %v844_v49  ;;  %1787 = vmatpush1.bf16.msra.mxu1 %v1786_v41  ;;  %1085 = vmatprep.mubr.f32.mxu1 %v1882_v15 }
 0x4a0   :  { %1198 = vmatprep.mubr.f32.mxu0 %v1882_v15  ;;  %v865_v46 = vmul.f32 %v857_v22, %v833_v53  ;;  %1789 = vmatprep.subr.bf16.mxu1 %v1788_v48 }
 0x4a1   :  { %v1824_v62 = vpop.eup %1823 }
 0x4a2   :  { %1086 = vmatmul.mubr.f32.gmra.mrb[14].mxu1 %v865_v46  ;;  %1199 = vmatmul.mubr.f32.gmra.mrb[38].mxu0 %v865_v46  ;;  %v858_v1 = vadd.f32 1.0, %v1824_v62 }
 0x4a3   :  { %1791 = vmatpush1.bf16.msra.mxu1 %v1790_v55  ;;  %1091 = vmatprep.mubr.f32.mxu1 %v1882_v15 }
 0x4a4   :  { %1204 = vmatprep.mubr.f32.mxu0 %v1882_v15  ;;  %v866_v3 = vmul.f32 %v858_v1, %v834_v0  ;;  %1793 = vmatprep.subr.bf16.mxu1 %v1792_v56 }
 0x4a5   :  { %v1826_v7 = vpop.eup %1825 }
 0x4a6   :  { %1092 = vmatmul.mubr.f32.gmra.mrb[16].mxu1 %v866_v3  ;;  %1205 = vmatmul.mubr.f32.gmra.mrb[40].mxu0 %v866_v3  ;;  %v859_v10 = vadd.f32 1.0, %v1826_v7 }
 0x4a7   :  { %1795 = vmatpush1.bf16.msra.mxu1 %v1794_v2  ;;  %1097 = vmatprep.mubr.f32.mxu1 %v1882_v15 }
 0x4a8   :  { %1210 = vmatprep.mubr.f32.mxu0 %v1882_v15  ;;  %v867_v12 = vmul.f32 %v859_v10, %v835_v52  ;;  %1797 = vmatprep.subr.bf16.mxu1 %v1796_v4 }
 0x4a9   :  { %v1828_v18 = vpop.eup %1827 }
 0x4aa   :  { %1098 = vmatmul.mubr.f32.gmra.mrb[18].mxu1 %v867_v12  ;;  %1211 = vmatmul.mubr.f32.gmra.mrb[42].mxu0 %v867_v12  ;;  %v860_v20 = vadd.f32 1.0, %v1828_v18 }
 0x4ab   :  { %1799 = vmatpush1.bf16.msra.mxu1 %v1798_v11  ;;  %1103 = vmatprep.mubr.f32.mxu1 %v1882_v15 }
 0x4ac   :  { %1216 = vmatprep.mubr.f32.mxu0 %v1882_v15  ;;  %v868_v23 = vmul.f32 %v860_v20, %v836_v19  ;;  %1801 = vmatprep.subr.bf16.mxu1 %v1800_v13 }
 0x4ae   :  { %1104 = vmatmul.mubr.f32.gmra.mrb[20].mxu1 %v868_v23  ;;  %1217 = vmatmul.mubr.f32.gmra.mrb[44].mxu0 %v868_v23 }
 0x4af   :  { %1803 = vmatpush1.bf16.msra.mxu1 %v1802_v21  ;;  %1287 = vmatprep.mubr.f32.mxu1 %v1882_v15 }
 0x4b2   :  { %1288 = vmatmul.mubr.f32.vlgmr.msra.gmra.mrb[22].mxu1 %v2222_v63  ;;  %v967_v63 = vlaneseq }
 0x4b3   :  { %1293 = vmatprep.mubr.f32.mxu1 %v1882_v15 }
 0x4b6   :  { %1294 = vmatmul.mubr.f32.gmra.mrb[24].mxu1 %v2233_v14  ;;  %v2280_v14 = vshrl.u32 %v967_v63, 7 }
 0x4b7   :  { %1299 = vmatprep.mubr.f32.mxu1 %v1882_v15 }
 0x4b8   :  { %v969_v24 = vsub.s32 0, %v2280_v14  ;;  %v977_v60 = vsub.s32 2, %v2280_v14  ;;  %v973_v26 = vsub.s32 1, %v2280_v14  ;;  %v981_v27 = vsub.s32 3, %v2280_v14 }
 0x4ba   :  { %1300 = vmatmul.mubr.f32.gmra.mrb[26].mxu1 %v2244_v31  ;;  %v2292_v28 = vrot.slane %v2287_v25, %v969_v24  ;;  %v2298_v29 = vrot.slane %v2287_v25, %v973_v26  ;;  %v2301_v30 = vrot.slane %v2287_v25, %v981_v27  ;;  %v985_v24 = vsub.s32 4, %v2280_v14 }
 0x4bb   :  { %1305 = vmatprep.mubr.f32.mxu1 %v1882_v15  ;;  %v989_v27 = vsub.s32 5, %v2280_v14 }
 0x4bd   :  { %v990_v14 = vrot.slane %v2287_v25, %v989_v27 }
 0x4be   :  { %1306 = vmatmul.mubr.f32.gmra.mrb[28].mxu1 %v2253_v44 }
 0x4bf   :  { %1311 = vmatprep.mubr.f32.mxu1 %v1882_v15 }
 0x4c2   :  { %1312 = vmatmul.mubr.f32.gmra.mrb[30].mxu1 %v865_v46 }
 0x4c3   :  { %1317 = vmatprep.mubr.f32.mxu1 %v1882_v15 }
 0x4c6   :  { %1318 = vmatmul.mubr.f32.gmra.mrb[32].mxu1 %v866_v3 }
 0x4c7   :  { %1323 = vmatprep.mubr.f32.mxu1 %v1882_v15 }
 0x4ca   :  { %1324 = vmatmul.mubr.f32.gmra.mrb[34].mxu1 %v867_v12 }
 0x4cb   :  { %1329 = vmatprep.mubr.f32.mxu1 %v1882_v15  ;;  %v2295_v15 = vrot.slane %v2287_v25, %v977_v60 }
 0x4ce   :  { %1330 = vmatmul.mubr.f32.gmra.mrb[36].mxu1 %v868_v23 }
 0x565   :  { %v1063_v31 = vpop.f32.mrb[6].mxu1  ;;  %v1176_v42 = vpop.f32.mrb[30].mxu0 }
 0x566   :  { %v1064_v32 = vadd.f32 %v1063_v31, %v2292_v28  ;;  %v1177_v33 = vadd.f32 %v1176_v42, %v2295_v15  ;;  %v1065_v34 = vpop.f32.mrb[7].mxu1  ;;  %v1178_v35 = vpop.f32.mrb[31].mxu0 }
 0x567   :  { %v1066_v36 = vadd.f32 %v1065_v34, %v2298_v29  ;;  %v1179_v37 = vadd.f32 %v1178_v35, %v2301_v30 }
 0x568   :  { %1336 = vst [vmem:[#allocation5] sm:$0xff] %v1064_v32  ;;  %1338 = vst [vmem:[#allocation5 + $0x10] sm:$0xff] %v1177_v33 }
 0x569   :  { %1337 = vst [vmem:[#allocation5 + $0x8] sm:$0xff] %v1066_v36  ;;  %1339 = vst [vmem:[#allocation5 + $0x18] sm:$0xff] %v1179_v37  ;;  %v1069_v38 = vpop.f32.mrb[8].mxu1  ;;  %v1182_v58 = vpop.f32.mrb[32].mxu0  ;;  %v986_v36 = vrot.slane %v2287_v25, %v985_v24 }
 0x56a   :  { %v1070_v40 = vadd.f32 %v1069_v38, %v2292_v28  ;;  %v1183_v39 = vadd.f32 %v1182_v58, %v2295_v15  ;;  %v1071_v41 = vpop.f32.mrb[9].mxu1  ;;  %v1184_v44 = vpop.f32.mrb[33].mxu0 }
 0x56b   :  { %v1072_v48 = vadd.f32 %v1071_v41, %v2298_v29  ;;  %v1185_v45 = vadd.f32 %v1184_v44, %v2301_v30 }
 0x56c   :  { %1342 = vst [vmem:[#allocation5 + $0x30] sm:$0xff] %v1070_v40  ;;  %1344 = vst [vmem:[#allocation5 + $0x40] sm:$0xff] %v1183_v39 }
 0x56d   :  { %1343 = vst [vmem:[#allocation5 + $0x38] sm:$0xff] %v1072_v48  ;;  %1345 = vst [vmem:[#allocation5 + $0x48] sm:$0xff] %v1185_v45  ;;  %v1075_v43 = vpop.f32.mrb[10].mxu1  ;;  %v1188_v47 = vpop.f32.mrb[34].mxu0 }
 0x56e   :  { %v1076_v49 = vadd.f32 %v1075_v43, %v2292_v28  ;;  %v1189_v50 = vadd.f32 %v1188_v47, %v2295_v15  ;;  %v1077_v51 = vpop.f32.mrb[11].mxu1  ;;  %v1190_v53 = vpop.f32.mrb[35].mxu0 }
 0x56f   :  { %v1078_v22 = vadd.f32 %v1077_v51, %v2298_v29  ;;  %v1191_v55 = vadd.f32 %v1190_v53, %v2301_v30 }
 0x570   :  { %1348 = vst [vmem:[#allocation5 + $0x60] sm:$0xff] %v1076_v49  ;;  %1350 = vst [vmem:[#allocation5 + $0x70] sm:$0xff] %v1189_v50 }
 0x571   :  { %1349 = vst [vmem:[#allocation5 + $0x68] sm:$0xff] %v1078_v22  ;;  %1351 = vst [vmem:[#allocation5 + $0x78] sm:$0xff] %v1191_v55  ;;  %v1081_v46 = vpop.f32.mrb[12].mxu1  ;;  %v1194_v56 = vpop.f32.mrb[36].mxu0 }
 0x572   :  { %v1082_v57 = vadd.f32 %v1081_v46, %v2292_v28  ;;  %v1195_v61 = vadd.f32 %v1194_v56, %v2295_v15  ;;  %v1083_v62 = vpop.f32.mrb[13].mxu1  ;;  %v1196_v54 = vpop.f32.mrb[37].mxu0 }
 0x573   :  { %v1084_v59 = vadd.f32 %v1083_v62, %v2298_v29  ;;  %v1197_v0 = vadd.f32 %v1196_v54, %v2301_v30 }
 0x574   :  { %1354 = vst [vmem:[#allocation5 + $0x90] sm:$0xff] %v1082_v57  ;;  %1356 = vst [vmem:[#allocation5 + $0xa0] sm:$0xff] %v1195_v61 }
 0x575   :  { %1355 = vst [vmem:[#allocation5 + $0x98] sm:$0xff] %v1084_v59  ;;  %1357 = vst [vmem:[#allocation5 + $0xa8] sm:$0xff] %v1197_v0  ;;  %v1087_v1 = vpop.f32.mrb[14].mxu1  ;;  %v1200_v2 = vpop.f32.mrb[38].mxu0 }
 0x576   :  { %v1088_v3 = vadd.f32 %v1087_v1, %v2292_v28  ;;  %v1201_v4 = vadd.f32 %v1200_v2, %v2295_v15  ;;  %v1089_v5 = vpop.f32.mrb[15].mxu1  ;;  %v1202_v6 = vpop.f32.mrb[39].mxu0 }
 0x577   :  { %v1090_v7 = vadd.f32 %v1089_v5, %v2298_v29  ;;  %v1203_v8 = vadd.f32 %v1202_v6, %v2301_v30 }
 0x578   :  { %1360 = vst [vmem:[#allocation5 + $0xc0] sm:$0xff] %v1088_v3  ;;  %1362 = vst [vmem:[#allocation5 + $0xd0] sm:$0xff] %v1201_v4 }
 0x579   :  { %1361 = vst [vmem:[#allocation5 + $0xc8] sm:$0xff] %v1090_v7  ;;  %1363 = vst [vmem:[#allocation5 + $0xd8] sm:$0xff] %v1203_v8  ;;  %v1093_v9 = vpop.f32.mrb[16].mxu1  ;;  %v1206_v52 = vpop.f32.mrb[40].mxu0 }
 0x57a   :  { %v1094_v10 = vadd.f32 %v1093_v9, %v2292_v28  ;;  %v1207_v11 = vadd.f32 %v1206_v52, %v2295_v15  ;;  %v1095_v12 = vpop.f32.mrb[17].mxu1  ;;  %v1208_v13 = vpop.f32.mrb[41].mxu0 }
 0x57b   :  { %v1096_v16 = vadd.f32 %v1095_v12, %v2298_v29  ;;  %v1209_v17 = vadd.f32 %v1208_v13, %v2301_v30 }
 0x57c   :  { %1366 = vst [vmem:[#allocation5 + $0xf0] sm:$0xff] %v1094_v10  ;;  %1368 = vst [vmem:[#allocation5 + $0x100] sm:$0xff] %v1207_v11 }
 0x57d   :  { %1367 = vst [vmem:[#allocation5 + $0xf8] sm:$0xff] %v1096_v16  ;;  %1369 = vst [vmem:[#allocation5 + $0x108] sm:$0xff] %v1209_v17  ;;  %v1099_v18 = vpop.f32.mrb[18].mxu1  ;;  %v1212_v19 = vpop.f32.mrb[42].mxu0 }
 0x57e   :  { %v1100_v20 = vadd.f32 %v1099_v18, %v2292_v28  ;;  %v1213_v21 = vadd.f32 %v1212_v19, %v2295_v15  ;;  %v1101_v23 = vpop.f32.mrb[19].mxu1  ;;  %v1214_v63 = vpop.f32.mrb[43].mxu0 }
 0x57f   :  { %v1102_v60 = vadd.f32 %v1101_v23, %v2298_v29  ;;  %v1215_v26 = vadd.f32 %v1214_v63, %v2301_v30 }
 0x580   :  { %1372 = vst [vmem:[#allocation5 + $0x120] sm:$0xff] %v1100_v20  ;;  %1374 = vst [vmem:[#allocation5 + $0x130] sm:$0xff] %v1213_v21 }
 0x581   :  { %1373 = vst [vmem:[#allocation5 + $0x128] sm:$0xff] %v1102_v60  ;;  %1375 = vst [vmem:[#allocation5 + $0x138] sm:$0xff] %v1215_v26  ;;  %v1105_v31 = vpop.f32.mrb[20].mxu1  ;;  %v1218_v42 = vpop.f32.mrb[44].mxu0 }
 0x582   :  { %v1106_v32 = vadd.f32 %v1105_v31, %v2292_v28  ;;  %v1219_v33 = vadd.f32 %v1218_v42, %v2295_v15  ;;  %v1107_v34 = vpop.f32.mrb[21].mxu1  ;;  %v1220_v35 = vpop.f32.mrb[45].mxu0 }
 0x583   :  { %v1108_v37 = vadd.f32 %v1107_v34, %v2298_v29  ;;  %v1221_v38 = vadd.f32 %v1220_v35, %v2301_v30 }
 0x584   :  { %1378 = vst [vmem:[#allocation5 + $0x150] sm:$0xff] %v1106_v32  ;;  %1380 = vst [vmem:[#allocation5 + $0x160] sm:$0xff] %v1219_v33 }
 0x585   :  { %1379 = vst [vmem:[#allocation5 + $0x158] sm:$0xff] %v1108_v37  ;;  %1381 = vst [vmem:[#allocation5 + $0x168] sm:$0xff] %v1221_v38  ;;  %v1289_v58 = vpop.f32.mrb[22].mxu1 }
 0x586   :  { %v1290_v40 = vadd.f32 %v1289_v58, %v986_v36  ;;  %v1291_v39 = vpop.f32.mrb[23].mxu1 }
 0x587   :  { %v1292_v28 = vadd.f32 %v1291_v39, %v990_v14 }
 0x588   :  { %1340 = vst [vmem:[#allocation5 + $0x20] sm:$0xff] %v1290_v40 }
 0x589   :  { %1341 = vst [vmem:[#allocation5 + $0x28] sm:$0xff] %v1292_v28  ;;  %v1295_v15 = vpop.f32.mrb[24].mxu1 }
 0x58a   :  { %v1296_v41 = vadd.f32 %v1295_v15, %v986_v36  ;;  %v1297_v44 = vpop.f32.mrb[25].mxu1 }
 0x58b   :  { %v1298_v48 = vadd.f32 %v1297_v44, %v990_v14 }
 0x58c   :  { %1346 = vst [vmem:[#allocation5 + $0x50] sm:$0xff] %v1296_v41 }
 0x58d   :  { %1347 = vst [vmem:[#allocation5 + $0x58] sm:$0xff] %v1298_v48  ;;  %v1301_v29 = vpop.f32.mrb[26].mxu1 }
 0x58e   :  { %v1302_v30 = vadd.f32 %v1301_v29, %v986_v36  ;;  %v1303_v45 = vpop.f32.mrb[27].mxu1 }
 0x58f   :  { %v1304_v25 = vadd.f32 %v1303_v45, %v990_v14 }
 0x590   :  { %1352 = vst [vmem:[#allocation5 + $0x80] sm:$0xff] %v1302_v30 }
 0x591   :  { %1353 = vst [vmem:[#allocation5 + $0x88] sm:$0xff] %v1304_v25  ;;  %v1307_v43 = vpop.f32.mrb[28].mxu1 }
 0x592   :  { %v1308_v47 = vadd.f32 %v1307_v43, %v986_v36  ;;  %v1309_v49 = vpop.f32.mrb[29].mxu1 }
 0x593   :  { %v1310_v50 = vadd.f32 %v1309_v49, %v990_v14 }
 0x594   :  { %1358 = vst [vmem:[#allocation5 + $0xb0] sm:$0xff] %v1308_v47 }
 0x595   :  { %1359 = vst [vmem:[#allocation5 + $0xb8] sm:$0xff] %v1310_v50  ;;  %v1313_v51 = vpop.f32.mrb[30].mxu1 }
 0x596   :  { %v1314_v53 = vadd.f32 %v1313_v51, %v986_v36  ;;  %v1315_v22 = vpop.f32.mrb[31].mxu1 }
 0x597   :  { %v1316_v55 = vadd.f32 %v1315_v22, %v990_v14 }
 0x598   :  { %1364 = vst [vmem:[#allocation5 + $0xe0] sm:$0xff] %v1314_v53 }
 0x599   :  { %1365 = vst [vmem:[#allocation5 + $0xe8] sm:$0xff] %v1316_v55  ;;  %v1319_v46 = vpop.f32.mrb[32].mxu1 }
 0x59a   :  { %v1320_v56 = vadd.f32 %v1319_v46, %v986_v36  ;;  %v1321_v57 = vpop.f32.mrb[33].mxu1 }
 0x59b   :  { %v1322_v61 = vadd.f32 %v1321_v57, %v990_v14 }
 0x59c   :  { %1370 = vst [vmem:[#allocation5 + $0x110] sm:$0xff] %v1320_v56 }
 0x59d   :  { %1371 = vst [vmem:[#allocation5 + $0x118] sm:$0xff] %v1322_v61  ;;  %v1325_v62 = vpop.f32.mrb[34].mxu1 }
 0x59e   :  { %v1326_v54 = vadd.f32 %v1325_v62, %v986_v36  ;;  %v1327_v59 = vpop.f32.mrb[35].mxu1 }
 0x59f   :  { %v1328_v0 = vadd.f32 %v1327_v59, %v990_v14 }
 0x5a0   :  { %1376 = vst [vmem:[#allocation5 + $0x140] sm:$0xff] %v1326_v54 }
 0x5a1   :  { %1377 = vst [vmem:[#allocation5 + $0x148] sm:$0xff] %v1328_v0  ;;  %v1331_v1 = vpop.f32.mrb[36].mxu1 }
 0x5a2   :  { %v1332_v2 = vadd.f32 %v1331_v1, %v986_v36  ;;  %v1333_v3 = vpop.f32.mrb[37].mxu1 }
 0x5a3   :  { %v1334_v4 = vadd.f32 %v1333_v3, %v990_v14 }
 0x5a4   :  { %1382 = vst [vmem:[#allocation5 + $0x170] sm:$0xff] %v1332_v2 }
 0x5a5   :  { %1383 = vst [vmem:[#allocation5 + $0x178] sm:$0xff] %v1334_v4 }
 0x5a6   :  { %1862 = shalt.err (!%p1859_p12)
}
 0x5a7   :  { %s1863_s13 = scalar_lea.hbm %s2363_s9, 6144 }
 0x5a8   :  { %p1864_p13 = scmp.ne.s32.totalorder %s2363_s9, %s1863_s13  ;;  %p1867_p0 = scmp.lt.u32.totalorder %s1863_s13, %s2363_s9 }
 0x5aa   :  { %p1869_p1 = pnand %p1867_p0, %p1864_p13 }
 0x5ac   :  { %1872 = shalt.err (!%p1869_p1)
}
 0x5ad   :  { %1395 = dma.vmem_to_hbm [thread:$0]  %s1390_s10, 6144, %s2363_s9, [#allocation4], %s1878_s19, %s1878_s19, %s1879_s20  }
 0x5ae   :  { %1875 = dma.done.wait [#allocation4], 6144  }
 0x5af   :  { %1876 = vsyncadd [#allocation4], 4294961152 }
 0x5b0   :  { %1399 = vsyncpa [#allocation3], 1 }
 0x5b1   :  { %1400 = vsyncpa [#allocation4], 1 }

</bundles_post_ra>
